<compile_context>
chip_gen: v6e
topology: v6e:2x2x1
jax: 0.10.0
libtpu: 0.0.40
codegen_flags: <defaults>
</compile_context>

<pallas_src>
import jax
import jax.numpy as jnp
from jax.experimental import pallas as pl
from jax.experimental.pallas import tpu as pltpu

_LANE = 128


def _round_up(x: int, m: int) -> int:
    return ((x + m - 1) // m) * m


# ---------------------------------------------------------------------------
# Kernel body
# ---------------------------------------------------------------------------
def _make_fused_mlp_kernel(layer_cfgs, eps: float = 1e-5):
    """Kernel over one batch tile.

    Refs: (x_ref, [w_ref, packed_ref] * n_layers, o_ref)
      w_ref:      (Din, Dout) in the matmul dtype (host-cast)
      packed_ref: (1, Dout) f32 = [bias]            for layers without LN
                  (3, Dout) f32 = [bias,gamma,beta] for layers with LN
    """

    def kernel(*refs):
        o_ref = refs[-1]
        it = iter(refs[:-1])
        h = next(it)[...]  # x tile, already in matmul dtype

        for apply_ln, apply_act in layer_cfgs:
            w = next(it)[...]
            p = next(it)[...]          # f32 packed params
            b = p[0:1, :]

            lhs = h if h.dtype == w.dtype else h.astype(w.dtype)
            y = jnp.dot(lhs, w, preferred_element_type=jnp.float32) + b

            if apply_ln:
                g = p[1:2, :]
                beta = p[2:3, :]
                # Two independent lane-reductions (overlap on the XLU).
                mean = jnp.mean(y, axis=-1, keepdims=True)
                msq = jnp.mean(y * y, axis=-1, keepdims=True)
                var = jnp.maximum(msq - mean * mean, 0.0)
                y = (y - mean) * jax.lax.rsqrt(var + eps) * g + beta

            if apply_act:
                # Mish with a single exp:
                #   t = exp(y); tanh(softplus(y)) = t(t+2) / (t(t+2)+2)
                # y > 20 selects y directly (PyTorch softplus threshold=20).
                t = jnp.exp(jnp.minimum(y, 20.0))
                u = t * (t + 2.0)
                d = u + 2.0
                r = pl.reciprocal(d, approx=True)
                r = r * (2.0 - d * r)          # one Newton step, VPU-only
                y = jnp.where(y > 20.0, y, y * u * r)

            h = y

        o_ref[...] = h.astype(o_ref.dtype)

    return kernel


# ---------------------------------------------------------------------------
# Wrapper
# ---------------------------------------------------------------------------
def _choose_batch_tile(B: int, max_width: int, matmul_dtype):
    """Pick a batch tile and padded batch size.

    - tile is a multiple of the sublane pack (16 for bf16, 8 for f32)
    - width-aware ceiling keeps activation temporaries modest (v7x: 64 MiB VMEM)
    - medium/large batches get >= 2 grid steps so "parallel" can shard across
      v7x's two TensorCores.
    """
    sublane = 16 if matmul_dtype == jnp.bfloat16 else 8
    max_tile = 512 if max_width <= 2048 else 256
    if B <= max_tile:
        if B >= 2 * max(sublane, 64):
            tb = _round_up(pl.cdiv(B, 2), sublane)   # split across 2 TCs
        else:
            tb = _round_up(B, sublane)               # tiny batch: 1 tile
    else:
        tb = max_tile
    return tb, _round_up(B, tb)


def _const_spec(shape):
    """Constant-index BlockSpec; single-buffered (data never changes)."""
    try:
        return pl.BlockSpec(shape, lambda i: (0, 0),
                            pipeline_mode=pl.Buffered(1))
    except (TypeError, AttributeError):
        return pl.BlockSpec(shape, lambda i: (0, 0))


def mlp_forward(x, params, use_layernorm: bool, *, matmul_dtype=jnp.bfloat16,
                eps: float = 1e-5):
    """Run the full MLP as one fused Pallas kernel, tiled over the batch.

    matmul_dtype: dtype of the matmul operands (bf16 default for native MXU
    rate; pass None for strict f32 parity). Accumulation and all elementwise
    math stay in f32.
    """
    B, d_in0 = x.shape
    out_dtype = x.dtype
    n = len(params)

    widths = [d_in0] + [w.shape[1] for (w, _, _, _) in params]
    max_width = max(widths)
    tb, B_pad = _choose_batch_tile(B, max_width, matmul_dtype)

    # Lane-dense final store: pad last layer's output columns to 128.
    d_out_last = params[-1][0].shape[1]
    d_out_pad = _round_up(d_out_last, _LANE)

    if B_pad != B:
        x = jnp.pad(x, ((0, B_pad - B), (0, 0)))
    if matmul_dtype is not None:
        x = x.astype(matmul_dtype)       # host-side cast (halves x DMA too)

    layer_cfgs = []
    kernel_args = [x]
    in_specs = [pl.BlockSpec((tb, d_in0), lambda i: (i, 0))]

    sublane = 16 if matmul_dtype == jnp.bfloat16 else 8
    w_itemsize = 2 if matmul_dtype == jnp.bfloat16 else 4
    param_bytes = 0
    flops = 0
    transcendentals = 0

    for li, (w, b, gamma, beta) in enumerate(params):
        last = li == n - 1
        apply_ln = bool(use_layernorm and not last)
        apply_act = not last
        layer_cfgs.append((apply_ln, apply_act))

        d_in, d_out = w.shape
        if last and d_out_pad != d_out:
            w = jnp.pad(w, ((0, 0), (0, d_out_pad - d_out)))
            b = jnp.pad(b, (0, d_out_pad - d_out))
            d_out = d_out_pad

        # Host-side dtype prep: weights in the matmul dtype, params in f32.
        w = w.astype(matmul_dtype) if matmul_dtype is not None else w.astype(jnp.float32)
        kernel_args.append(w)
        in_specs.append(_const_spec((d_in, d_out)))

        if apply_ln:
            packed = jnp.stack([b.astype(jnp.float32),
                                gamma.astype(jnp.float32),
                                beta.astype(jnp.float32)], axis=0)
        else:
            packed = b.astype(jnp.float32).reshape(1, d_out)
        kernel_args.append(packed)
        in_specs.append(_const_spec(packed.shape))

        param_bytes += (_round_up(d_in, sublane) * _round_up(d_out, _LANE)
                        * w_itemsize)
        param_bytes += 8 * _round_up(d_out, _LANE) * 4
        flops += 2 * B_pad * d_in * d_out
        if apply_act:
            transcendentals += B_pad * d_out

    # Explicit VMEM budget: resident params (single-buffered) + pipelined
    # x/out tiles + live activation temporaries, clamped by chip capacity.
    out_itemsize = jnp.dtype(out_dtype).itemsize
    act_bytes = (2 * tb * _round_up(d_in0, _LANE) * w_itemsize
                 + 2 * tb * d_out_pad * out_itemsize
                 + 6 * tb * _round_up(max_width, _LANE) * 4)
    vmem_needed = param_bytes + act_bytes + (4 << 20)
    try:
        cap = getattr(pltpu.get_tpu_info(), "vmem_capacity_bytes", 64 << 20)
    except Exception:
        cap = 64 << 20
    vmem_limit = int(min(max(vmem_needed, 32 << 20), 0.875 * cap))

    bytes_accessed = int(
        x.size * x.dtype.itemsize
        + sum(a.size * a.dtype.itemsize for a in kernel_args[1:])
        + B_pad * d_out_pad * out_itemsize)
    cost = pl.CostEstimate(flops=int(flops),
                           transcendentals=int(transcendentals),
                           bytes_accessed=bytes_accessed)

    kernel = _make_fused_mlp_kernel(tuple(layer_cfgs), eps=eps)

    out = pl.pallas_call(
        kernel,
        out_shape=jax.ShapeDtypeStruct((B_pad, d_out_pad), out_dtype),
        grid_spec=pl.GridSpec(
            grid=(B_pad // tb,),
            in_specs=in_specs,
            out_specs=pl.BlockSpec((tb, d_out_pad), lambda i: (i, 0)),
        ),
        compiler_params=pltpu.CompilerParams(
            dimension_semantics=("parallel",),
            vmem_limit_bytes=vmem_limit,
        ),
        cost_estimate=cost,
    )(*kernel_args)

    if B_pad != B or d_out_pad != d_out_last:
        out = out[:B, :d_out_last]
    return out


# ---------------------------------------------------------------------------
# Init + pure-JAX reference (mirrors the PyTorch module)
# ---------------------------------------------------------------------------
def init_mlp_params(key, dims, dtype=jnp.float32):
    """xavier_uniform-style init. Weights stored as (Din, Dout)."""
    params = []
    for i in range(len(dims) - 1):
        key, kw, kb = jax.random.split(key, 3)
        fan_in, fan_out = dims[i], dims[i + 1]
        limit = (6.0 / (fan_in + fan_out)) ** 0.5
        w = jax.random.uniform(kw, (fan_in, fan_out), dtype, -limit, limit)
        bound = 1.0 / (fan_in ** 0.5)
        b = jax.random.uniform(kb, (fan_out,), dtype, -bound, bound)
        gamma = jnp.ones((fan_out,), dtype)   # nn.LayerNorm default init
        beta = jnp.zeros((fan_out,), dtype)
        params.append((w, b, gamma, beta))
    return params


def mlp_reference(x, params, use_layernorm: bool, eps=1e-5):
    """Pure-JAX reference (exact mish = x * tanh(softplus(x)))."""
    n = len(params)
    for i, (w, b, g, beta) in enumerate(params):
        y = x @ w + b
        if i < n - 1:
            if use_layernorm:
                mean = jnp.mean(y, axis=-1, keepdims=True)
                var = jnp.mean((y - mean) ** 2, axis=-1, keepdims=True)
                y = (y - mean) / jnp.sqrt(var + eps) * g + beta
            sp = jnp.where(y > 20.0, y, jnp.log1p(jnp.exp(jnp.minimum(y, 20.0))))
            y = y * jnp.tanh(sp)
        x = y
    return x


if __name__ == "__main__":
    key = jax.random.PRNGKey(0)
    dims = [16, 32, 32, 8]          # MLP(dims=[16, 32, 32, 8], use_layernorm=True)
    use_layernorm = True

    key, kp = jax.random.split(key)
    params = init_mlp_params(kp, dims)

    # 1) Small batch, strict f32 parity with the PyTorch forward.
    key, kx = jax.random.split(key)
    x = jax.random.normal(kx, (8, dims[0]), jnp.float32)
    out = jax.block_until_ready(
        mlp_forward(x, params, use_layernorm, matmul_dtype=None))
    ref = mlp_reference(x, params, use_layernorm)
    assert out.shape == (8, dims[-1])
    err = float(jnp.max(jnp.abs(out - ref)))
    assert jnp.allclose(out, ref, atol=1e-4, rtol=1e-4), f"f32 max_err={err}"

    # 2) Awkward batch: exercises batch padding + 2-step "parallel" grid.
    key, kx2 = jax.random.split(key)
    x2 = jax.random.normal(kx2, (200, dims[0]), jnp.float32)
    out2 = jax.block_until_ready(
        mlp_forward(x2, params, use_layernorm, matmul_dtype=None))
    ref2 = mlp_reference(x2, params, use_layernorm)
    assert out2.shape == (200, dims[-1])
    err2 = float(jnp.max(jnp.abs(out2 - ref2)))
    assert jnp.allclose(out2, ref2, atol=1e-4, rtol=1e-4), f"f32 max_err={err2}"

    # 3) Default path: bf16 matmul operands (host-cast), f32 accumulation.
    out_bf = jax.block_until_ready(mlp_forward(x, params, use_layernorm))
    assert out_bf.shape == (8, dims[-1])
    assert bool(jnp.all(jnp.isfinite(out_bf)))
    assert jnp.allclose(out_bf, ref, atol=1e-1, rtol=1e-1), "bf16 tolerance"

    print("KERNEL_OK")
</pallas_src>

<mosaic_0001>
module attributes {stable_mosaic.version = 11 : i64} {
  func.func @kernel(%arg0: i32, %arg1: memref<8x16xf32, #tpu.memory_space<vmem>>, %arg2: memref<16x32xf32, #tpu.memory_space<vmem>>, %arg3: memref<3x32xf32, #tpu.memory_space<vmem>>, %arg4: memref<32x32xf32, #tpu.memory_space<vmem>>, %arg5: memref<3x32xf32, #tpu.memory_space<vmem>>, %arg6: memref<32x128xf32, #tpu.memory_space<vmem>>, %arg7: memref<1x128xf32, #tpu.memory_space<vmem>>, %arg8: memref<8x128xf32, #tpu.memory_space<vmem>>) attributes {dimension_semantics = [#tpu.dimension_semantics<parallel>], iteration_bounds = array<i64: 1>, scalar_prefetch = 0 : i64, scratch_operands = 0 : i64, tpu.core_type = #tpu.core_type<tc>, window_params = [{transform_indices = @transform_0, window_bounds = array<i64: 8, 16>}, {pipeline_mode = #tpu.pipeline_mode<synchronous>, transform_indices = @transform_1, window_bounds = array<i64: 16, 32>}, {pipeline_mode = #tpu.pipeline_mode<synchronous>, transform_indices = @transform_2, window_bounds = array<i64: 3, 32>}, {pipeline_mode = #tpu.pipeline_mode<synchronous>, transform_indices = @transform_3, window_bounds = array<i64: 32, 32>}, {pipeline_mode = #tpu.pipeline_mode<synchronous>, transform_indices = @transform_4, window_bounds = array<i64: 3, 32>}, {pipeline_mode = #tpu.pipeline_mode<synchronous>, transform_indices = @transform_5, window_bounds = array<i64: 32, 128>}, {pipeline_mode = #tpu.pipeline_mode<synchronous>, transform_indices = @transform_6, window_bounds = array<i64: 1, 128>}, {transform_indices = @transform_7, window_bounds = array<i64: 8, 128>}]} {
    %c0 = arith.constant 0 : index
    %c0_0 = arith.constant 0 : index
    %0 = vector.load %arg1[%c0, %c0_0] : memref<8x16xf32, #tpu.memory_space<vmem>>, vector<8x16xf32>
    %c0_1 = arith.constant 0 : index
    %c0_2 = arith.constant 0 : index
    %1 = vector.load %arg2[%c0_1, %c0_2] : memref<16x32xf32, #tpu.memory_space<vmem>>, vector<16x32xf32>
    %c0_3 = arith.constant 0 : index
    %c0_4 = arith.constant 0 : index
    %2 = vector.load %arg3[%c0_3, %c0_4] : memref<3x32xf32, #tpu.memory_space<vmem>>, vector<3x32xf32>
    %3 = vector.extract_strided_slice %2 {offsets = [0, 0], sizes = [1, 32], strides = [1, 1]} : vector<3x32xf32> to vector<1x32xf32>
    %cst = arith.constant dense<0.000000e+00> : vector<8x32xf32>
    %4 = tpu.matmul %0, %1, %cst {dimension_numbers = #tpu.dot_dimension_numbers<[1], [0], [0], [1], [0, 0, 1, 1], [], []>} : vector<8x16xf32>, vector<16x32xf32>, vector<8x32xf32> -> vector<8x32xf32>
    %5 = vector.broadcast %3 : vector<1x32xf32> to vector<8x32xf32>
    %6 = arith.addf %4, %5 : vector<8x32xf32>
    %7 = vector.extract_strided_slice %2 {offsets = [1, 0], sizes = [1, 32], strides = [1, 1]} : vector<3x32xf32> to vector<1x32xf32>
    %8 = vector.extract_strided_slice %2 {offsets = [2, 0], sizes = [1, 32], strides = [1, 1]} : vector<3x32xf32> to vector<1x32xf32>
    %cst_5 = arith.constant dense<0.000000e+00> : vector<8xf32>
    %9 = vector.multi_reduction <add>, %6, %cst_5 [1] : vector<8x32xf32> to vector<8xf32>
    %10 = vector.shape_cast %9 : vector<8xf32> to vector<8x1xf32>
    %cst_6 = arith.constant 3.200000e+01 : f32
    %11 = vector.broadcast %cst_6 : f32 to vector<8x1xf32>
    %12 = arith.divf %10, %11 : vector<8x1xf32>
    %13 = arith.mulf %6, %6 : vector<8x32xf32>
    %cst_7 = arith.constant dense<0.000000e+00> : vector<8xf32>
    %14 = vector.multi_reduction <add>, %13, %cst_7 [1] : vector<8x32xf32> to vector<8xf32>
    %15 = vector.shape_cast %14 : vector<8xf32> to vector<8x1xf32>
    %cst_8 = arith.constant 3.200000e+01 : f32
    %16 = vector.broadcast %cst_8 : f32 to vector<8x1xf32>
    %17 = arith.divf %15, %16 : vector<8x1xf32>
    %18 = arith.mulf %12, %12 : vector<8x1xf32>
    %19 = arith.subf %17, %18 : vector<8x1xf32>
    %cst_9 = arith.constant 0.000000e+00 : f32
    %20 = vector.broadcast %cst_9 : f32 to vector<8x1xf32>
    %21 = arith.maximumf %19, %20 : vector<8x1xf32>
    %22 = vector.broadcast %12 : vector<8x1xf32> to vector<8x32xf32>
    %23 = arith.subf %6, %22 : vector<8x32xf32>
    %cst_10 = arith.constant 9.99999974E-6 : f32
    %24 = vector.broadcast %cst_10 : f32 to vector<8x1xf32>
    %25 = arith.addf %21, %24 : vector<8x1xf32>
    %26 = math.rsqrt %25 : vector<8x1xf32>
    %27 = vector.broadcast %26 : vector<8x1xf32> to vector<8x32xf32>
    %28 = arith.mulf %23, %27 : vector<8x32xf32>
    %29 = vector.broadcast %7 : vector<1x32xf32> to vector<8x32xf32>
    %30 = arith.mulf %28, %29 : vector<8x32xf32>
    %31 = vector.broadcast %8 : vector<1x32xf32> to vector<8x32xf32>
    %32 = arith.addf %30, %31 : vector<8x32xf32>
    %cst_11 = arith.constant 2.000000e+01 : f32
    %33 = vector.broadcast %cst_11 : f32 to vector<8x32xf32>
    %34 = arith.minimumf %32, %33 : vector<8x32xf32>
    %35 = math.exp %34 : vector<8x32xf32>
    %cst_12 = arith.constant 2.000000e+00 : f32
    %36 = vector.broadcast %cst_12 : f32 to vector<8x32xf32>
    %37 = arith.addf %35, %36 : vector<8x32xf32>
    %38 = arith.mulf %35, %37 : vector<8x32xf32>
    %cst_13 = arith.constant 2.000000e+00 : f32
    %39 = vector.broadcast %cst_13 : f32 to vector<8x32xf32>
    %40 = arith.addf %38, %39 : vector<8x32xf32>
    %41 = tpu.reciprocal %40 {approx = true} : vector<8x32xf32> -> vector<8x32xf32>
    %42 = arith.mulf %40, %41 : vector<8x32xf32>
    %cst_14 = arith.constant 2.000000e+00 : f32
    %43 = vector.broadcast %cst_14 : f32 to vector<8x32xf32>
    %44 = arith.subf %43, %42 : vector<8x32xf32>
    %45 = arith.mulf %41, %44 : vector<8x32xf32>
    %cst_15 = arith.constant 2.000000e+01 : f32
    %46 = vector.broadcast %cst_15 : f32 to vector<8x32xf32>
    %47 = arith.cmpf ogt, %32, %46 : vector<8x32xf32>
    %48 = arith.mulf %32, %38 : vector<8x32xf32>
    %49 = arith.mulf %48, %45 : vector<8x32xf32>
    %50 = arith.select %47, %32, %49 : vector<8x32xi1>, vector<8x32xf32>
    %c0_16 = arith.constant 0 : index
    %c0_17 = arith.constant 0 : index
    %51 = vector.load %arg4[%c0_16, %c0_17] : memref<32x32xf32, #tpu.memory_space<vmem>>, vector<32x32xf32>
    %c0_18 = arith.constant 0 : index
    %c0_19 = arith.constant 0 : index
    %52 = vector.load %arg5[%c0_18, %c0_19] : memref<3x32xf32, #tpu.memory_space<vmem>>, vector<3x32xf32>
    %53 = vector.extract_strided_slice %52 {offsets = [0, 0], sizes = [1, 32], strides = [1, 1]} : vector<3x32xf32> to vector<1x32xf32>
    %cst_20 = arith.constant dense<0.000000e+00> : vector<8x32xf32>
    %54 = tpu.matmul %50, %51, %cst_20 {dimension_numbers = #tpu.dot_dimension_numbers<[1], [0], [0], [1], [0, 0, 1, 1], [], []>} : vector<8x32xf32>, vector<32x32xf32>, vector<8x32xf32> -> vector<8x32xf32>
    %55 = vector.broadcast %53 : vector<1x32xf32> to vector<8x32xf32>
    %56 = arith.addf %54, %55 : vector<8x32xf32>
    %57 = vector.extract_strided_slice %52 {offsets = [1, 0], sizes = [1, 32], strides = [1, 1]} : vector<3x32xf32> to vector<1x32xf32>
    %58 = vector.extract_strided_slice %52 {offsets = [2, 0], sizes = [1, 32], strides = [1, 1]} : vector<3x32xf32> to vector<1x32xf32>
    %cst_21 = arith.constant dense<0.000000e+00> : vector<8xf32>
    %59 = vector.multi_reduction <add>, %56, %cst_21 [1] : vector<8x32xf32> to vector<8xf32>
    %60 = vector.shape_cast %59 : vector<8xf32> to vector<8x1xf32>
    %cst_22 = arith.constant 3.200000e+01 : f32
    %61 = vector.broadcast %cst_22 : f32 to vector<8x1xf32>
    %62 = arith.divf %60, %61 : vector<8x1xf32>
    %63 = arith.mulf %56, %56 : vector<8x32xf32>
    %cst_23 = arith.constant dense<0.000000e+00> : vector<8xf32>
    %64 = vector.multi_reduction <add>, %63, %cst_23 [1] : vector<8x32xf32> to vector<8xf32>
    %65 = vector.shape_cast %64 : vector<8xf32> to vector<8x1xf32>
    %cst_24 = arith.constant 3.200000e+01 : f32
    %66 = vector.broadcast %cst_24 : f32 to vector<8x1xf32>
    %67 = arith.divf %65, %66 : vector<8x1xf32>
    %68 = arith.mulf %62, %62 : vector<8x1xf32>
    %69 = arith.subf %67, %68 : vector<8x1xf32>
    %cst_25 = arith.constant 0.000000e+00 : f32
    %70 = vector.broadcast %cst_25 : f32 to vector<8x1xf32>
    %71 = arith.maximumf %69, %70 : vector<8x1xf32>
    %72 = vector.broadcast %62 : vector<8x1xf32> to vector<8x32xf32>
    %73 = arith.subf %56, %72 : vector<8x32xf32>
    %cst_26 = arith.constant 9.99999974E-6 : f32
    %74 = vector.broadcast %cst_26 : f32 to vector<8x1xf32>
    %75 = arith.addf %71, %74 : vector<8x1xf32>
    %76 = math.rsqrt %75 : vector<8x1xf32>
    %77 = vector.broadcast %76 : vector<8x1xf32> to vector<8x32xf32>
    %78 = arith.mulf %73, %77 : vector<8x32xf32>
    %79 = vector.broadcast %57 : vector<1x32xf32> to vector<8x32xf32>
    %80 = arith.mulf %78, %79 : vector<8x32xf32>
    %81 = vector.broadcast %58 : vector<1x32xf32> to vector<8x32xf32>
    %82 = arith.addf %80, %81 : vector<8x32xf32>
    %cst_27 = arith.constant 2.000000e+01 : f32
    %83 = vector.broadcast %cst_27 : f32 to vector<8x32xf32>
    %84 = arith.minimumf %82, %83 : vector<8x32xf32>
    %85 = math.exp %84 : vector<8x32xf32>
    %cst_28 = arith.constant 2.000000e+00 : f32
    %86 = vector.broadcast %cst_28 : f32 to vector<8x32xf32>
    %87 = arith.addf %85, %86 : vector<8x32xf32>
    %88 = arith.mulf %85, %87 : vector<8x32xf32>
    %cst_29 = arith.constant 2.000000e+00 : f32
    %89 = vector.broadcast %cst_29 : f32 to vector<8x32xf32>
    %90 = arith.addf %88, %89 : vector<8x32xf32>
    %91 = tpu.reciprocal %90 {approx = true} : vector<8x32xf32> -> vector<8x32xf32>
    %92 = arith.mulf %90, %91 : vector<8x32xf32>
    %cst_30 = arith.constant 2.000000e+00 : f32
    %93 = vector.broadcast %cst_30 : f32 to vector<8x32xf32>
    %94 = arith.subf %93, %92 : vector<8x32xf32>
    %95 = arith.mulf %91, %94 : vector<8x32xf32>
    %cst_31 = arith.constant 2.000000e+01 : f32
    %96 = vector.broadcast %cst_31 : f32 to vector<8x32xf32>
    %97 = arith.cmpf ogt, %82, %96 : vector<8x32xf32>
    %98 = arith.mulf %82, %88 : vector<8x32xf32>
    %99 = arith.mulf %98, %95 : vector<8x32xf32>
    %100 = arith.select %97, %82, %99 : vector<8x32xi1>, vector<8x32xf32>
    %c0_32 = arith.constant 0 : index
    %c0_33 = arith.constant 0 : index
    %101 = vector.load %arg6[%c0_32, %c0_33] : memref<32x128xf32, #tpu.memory_space<vmem>>, vector<32x128xf32>
    %c0_34 = arith.constant 0 : index
    %c0_35 = arith.constant 0 : index
    %102 = vector.load %arg7[%c0_34, %c0_35] : memref<1x128xf32, #tpu.memory_space<vmem>>, vector<1x128xf32>
    %cst_36 = arith.constant dense<0.000000e+00> : vector<8x128xf32>
    %103 = tpu.matmul %100, %101, %cst_36 {dimension_numbers = #tpu.dot_dimension_numbers<[1], [0], [0], [1], [0, 0, 1, 1], [], []>} : vector<8x32xf32>, vector<32x128xf32>, vector<8x128xf32> -> vector<8x128xf32>
    %104 = vector.broadcast %102 : vector<1x128xf32> to vector<8x128xf32>
    %105 = arith.addf %103, %104 : vector<8x128xf32>
    %c0_37 = arith.constant 0 : index
    %c0_38 = arith.constant 0 : index
    %106 = vector.load %arg8[%c0_37, %c0_38] : memref<8x128xf32, #tpu.memory_space<vmem>>, vector<8x128xf32>
    tpu.vector_store %arg8[%c0_37, %c0_38], %105 {strides = array<i32>} : memref<8x128xf32, #tpu.memory_space<vmem>>, vector<8x128xf32>,
    return
  }
  func.func @transform_0(%arg0: i32) -> (i32, i32) {
    %c0_i32 = arith.constant 0 : i32
    %c0_i32_0 = arith.constant 0 : i32
    return %arg0, %c0_i32 : i32, i32
  }
  func.func @transform_1(%arg0: i32) -> (i32, i32) {
    %c0_i32 = arith.constant 0 : i32
    %c0_i32_0 = arith.constant 0 : i32
    %c0_i32_1 = arith.constant 0 : i32
    return %c0_i32, %c0_i32_0 : i32, i32
  }
  func.func @transform_2(%arg0: i32) -> (i32, i32) {
    %c0_i32 = arith.constant 0 : i32
    %c0_i32_0 = arith.constant 0 : i32
    %c0_i32_1 = arith.constant 0 : i32
    return %c0_i32, %c0_i32_0 : i32, i32
  }
  func.func @transform_3(%arg0: i32) -> (i32, i32) {
    %c0_i32 = arith.constant 0 : i32
    %c0_i32_0 = arith.constant 0 : i32
    %c0_i32_1 = arith.constant 0 : i32
    return %c0_i32, %c0_i32_0 : i32, i32
  }
  func.func @transform_4(%arg0: i32) -> (i32, i32) {
    %c0_i32 = arith.constant 0 : i32
    %c0_i32_0 = arith.constant 0 : i32
    %c0_i32_1 = arith.constant 0 : i32
    return %c0_i32, %c0_i32_0 : i32, i32
  }
  func.func @transform_5(%arg0: i32) -> (i32, i32) {
    %c0_i32 = arith.constant 0 : i32
    %c0_i32_0 = arith.constant 0 : i32
    %c0_i32_1 = arith.constant 0 : i32
    return %c0_i32, %c0_i32_0 : i32, i32
  }
  func.func @transform_6(%arg0: i32) -> (i32, i32) {
    %c0_i32 = arith.constant 0 : i32
    %c0_i32_0 = arith.constant 0 : i32
    %c0_i32_1 = arith.constant 0 : i32
    return %c0_i32, %c0_i32_0 : i32, i32
  }
  func.func @transform_7(%arg0: i32) -> (i32, i32) {
    %c0_i32 = arith.constant 0 : i32
    %c0_i32_0 = arith.constant 0 : i32
    return %arg0, %c0_i32 : i32, i32
  }
}

</mosaic_0001>

<bundles_post_ra>
// kernel: tpu_custom_call.1
= control target key start
LH: loop header
LB: loop body
LE: loop exit
PB: predicated region body
PF: predicated region fallthrough
CT: control target
= control target key end

     0   :  { %12 = vsyncpa [#allocation3], 0  ;;  %s742_s0 = inlined_call_operand.hbm [shape: f32[8,16], index: 0, kind: input, shape index: {}]   ;;  %s743_s1 = inlined_call_operand.hbm [shape: f32[16,32], index: 1, kind: input, shape index: {}]   ;;  %s744_s2 = inlined_call_operand.hbm [shape: f32[3,32], index: 2, kind: input, shape index: {}]   ;;  %s745_s3 = inlined_call_operand.hbm [shape: f32[32,32], index: 3, kind: input, shape index: {}]   ;;  %s746_s4 = inlined_call_operand.vmem [shape: f32[3,32], index: 4, kind: input, shape index: {}]   ;;  %s747_s5 = inlined_call_operand.hbm [shape: f32[32,128], index: 5, kind: input, shape index: {}]   ;;  %s748_s6 = inlined_call_operand.vmem [shape: f32[1,128], index: 6, kind: input, shape index: {}]   ;;  %s749_s7 = inlined_call_operand.hbm [shape: f32[8,128], index: 7, kind: output, shape index: {}]  }
   0x1   :  { %13 = vsyncpa [#allocation6], 0 }
   0x2   :  { %14 = vsyncpa [#allocation9], 0 }
   0x3   :  { %15 = vsyncpa [#allocation4], 0  ;;  %s635_s24 = smov [#allocation5]  }
   0x4   :  { %s31_s25 = sshll.u32 %s635_s24, 4  ;;  %s32_s25 = int_to_ptr.vmem [resolvable:$true] %s31_s25 }
   0x5   :  { %s515_s26 = scalar_lea.vmem %s32_s25, 256  ;;  %p520_p1 = scmp.lt.s32.totalorder %s32_s25, %s32_s25 }
   0x6   :  { %p516_p0 = scmp.ne.s32.totalorder %s32_s25, %s515_s26  ;;  %p521_p2 = scmp.lt.s32.totalorder %s515_s26, %s515_s26 }
   0x8   :  { %p522_p3 = por %p521_p2, %p520_p1 }
   0xa   :  { %p523_p4 = pnand %p522_p3, %p516_p0 }
   0xc   :  { %526 = shalt.err (!%p523_p4)
}
   0xd   :  { %s636_s27 = smov 128   ;;  %s637_s28 = smov 8  }
   0xe   :  { %37 = dma.hbm_to_vmem [thread:$0]  %s743_s1, 256, %s32_s25, [#allocation6], %s636_s27, %s636_s27, %s637_s28  }
   0xf   :  { %s638_s8 = smov [#allocation8]   ;;  %s639_s10 = smov [#allocation2]  }
  0x10   :  { %s53_s9 = sshll.u32 %s638_s8, 4  ;;  %s22_s11 = sshll.u32 %s639_s10, 4  ;;  %s54_s9 = int_to_ptr.vmem [resolvable:$true] %s53_s9  ;;  %s23_s11 = int_to_ptr.vmem [resolvable:$true] %s22_s11 }
  0x11   :  { %s535_s12 = scalar_lea.vmem %s54_s9, 512  ;;  %p540_p6 = scmp.lt.s32.totalorder %s54_s9, %s54_s9 }
  0x12   :  { %p536_p5 = scmp.ne.s32.totalorder %s54_s9, %s535_s12  ;;  %p541_p7 = scmp.lt.s32.totalorder %s535_s12, %s535_s12 }
  0x14   :  { %p542_p8 = por %p541_p7, %p540_p6 }
  0x16   :  { %p543_p9 = pnand %p542_p8, %p536_p5 }
  0x18   :  { %546 = shalt.err (!%p543_p9)
}
  0x19   :  { %59 = dma.hbm_to_vmem [thread:$0]  %s745_s3, 512, %s54_s9, [#allocation9], %s636_s27, %s636_s27, %s637_s28  }
  0x1a   :  { %s555_s1 = scalar_lea.vmem %s23_s11, 128  ;;  %p560_p11 = scmp.lt.s32.totalorder %s23_s11, %s23_s11 }
  0x1b   :  { %p556_p10 = scmp.ne.s32.totalorder %s23_s11, %s555_s1  ;;  %p561_p12 = scmp.lt.s32.totalorder %s555_s1, %s555_s1 }
  0x1d   :  { %p562_p13 = por %p561_p12, %p560_p11 }
  0x1f   :  { %p563_p0 = pnand %p562_p13, %p556_p10 }
  0x21   :  { %566 = shalt.err (!%p563_p0)
}
  0x22   :  { %25 = dma.hbm_to_vmem [thread:$0]  %s742_s0, 128, %s23_s11, [#allocation3]  }
  0x23   :  { %s640_s17 = smov [#allocation7]   ;;  %s641_s19 = smov [#allocation10]  }
  0x24   :  { %s44_s18 = sshll.u32 %s640_s17, 4  ;;  %s67_s20 = sshll.u32 %s641_s19, 4  ;;  %s45_s18 = int_to_ptr.vmem [resolvable:$true] %s44_s18  ;;  %s68_s20 = int_to_ptr.vmem [resolvable:$true] %s67_s20 }
  0x25   :  { %s575_s21 = scalar_lea.vmem %s45_s18, 64  ;;  %p580_p2 = scmp.lt.s32.totalorder %s45_s18, %s45_s18 }
  0x26   :  { %p576_p1 = scmp.ne.s32.totalorder %s45_s18, %s575_s21  ;;  %p581_p3 = scmp.lt.s32.totalorder %s575_s21, %s575_s21 }
  0x28   :  { %p582_p4 = por %p581_p3, %p580_p2 }
  0x2a   :  { %p583_p5 = pnand %p582_p4, %p576_p1 }
  0x2c   :  { %586 = shalt.err (!%p583_p5)
}
  0x2d   :  { %47 = dma.hbm_to_vmem [thread:$0]  %s744_s2, 64, %s45_s18, [#allocation6]  }
  0x2e   :  { %s595_s23 = scalar_lea.vmem %s68_s20, 512  ;;  %p600_p7 = scmp.lt.s32.totalorder %s68_s20, %s68_s20 }
  0x2f   :  { %p596_p6 = scmp.ne.s32.totalorder %s68_s20, %s595_s23  ;;  %p601_p8 = scmp.lt.s32.totalorder %s595_s23, %s595_s23 }
  0x31   :  { %p602_p9 = por %p601_p8, %p600_p7 }
  0x33   :  { %p603_p10 = pnand %p602_p9, %p596_p6 }
  0x35   :  { %606 = shalt.err (!%p603_p10)
}
  0x36   :  { %73 = dma.hbm_to_vmem [thread:$0]  %s747_s5, 512, %s68_s20, [#allocation9], %s636_s27, %s636_s27, %s637_s28  }
  0x37   :  { %627 = dma.done.wait [#allocation3], 128  }
  0x38   :  { %628 = vsyncadd [#allocation3], 4294967168 }
  0x39   :  { %629 = dma.done.wait [#allocation6], 320  }
  0x3a   :  { %630 = vsyncadd [#allocation6], 4294966976 }
  0x3b   :  { %631 = dma.done.wait [#allocation9], 1024  }
  0x3c   :  { %632 = vsyncadd [#allocation9], 4294966272  ;;  %v642_v0 = vmov 0.0   ;;  %vm643_vm0 = vmmov 0   ;;  %v93_v1 = vld [vmem:[#allocation5 + $0x8] sm:$0xff]  ;;  %v92_v2 = vld [vmem:[#allocation5] sm:$0xff]  ;;  %v95_v4 = vlaneseq }
  0x3d   :  { %456 = vmatprep.subr.mxu0 %v642_v0  ;;  %460 = vmatprep.mubr.msk.f32.mxu0 %vm643_vm0, %v642_v0  ;;  %v91_v3 = vld [vmem:[#allocation2] sm:$0xff]  ;;  %vm99_vm1 = vcmask 130048   ;;  %v94_v7 = vld [vmem:[#allocation7] sm:$0x7]  ;;  %vm173_vm2 = vcmask 261120   ;;  %v217_v16 = vld [vmem:[#allocation8 + $0x10] sm:$0xff] }
  0x3e   :  { %463 = vmatprep.subr.mxu1 %v642_v0  ;;  %471 = vmatprep.mubr.msk.f32.mxu1 %vm643_vm0, %v642_v0  ;;  %v716_v5 = vshrl.u32 %v95_v4, 7  ;;  %v218_v15 = vld [vmem:[#allocation8 + $0x18] sm:$0xff]  ;;  %v216_v17 = vld [vmem:[#allocation8 + $0x8] sm:$0xff]  ;;  %v215_v18 = vld [vmem:[#allocation8] sm:$0xff]  ;;  %s644_s26 = smov [#allocation11]  }
  0x3f   :  { %457 = vmatpush3.msra.mxu0 %v93_v1  ;;  %464 = vmatpush3.msra.mxu1 %v218_v15  ;;  %v219_v49 = vld [vmem:[%s746_s4] sm:$0x7]  ;;  %v340_v57 = vld [vmem:[#allocation10 + $0x18] sm:$0xff]  ;;  %v339_v58 = vld [vmem:[#allocation10 + $0x10] sm:$0xff]  ;;  %s428_s27 = sshll.u32 %s644_s26, 4  ;;  %s429_s27 = int_to_ptr.vmem [resolvable:$true] %s428_s27 }
  0x40   :  { %458 = vmatprep.subr.mxu0 %v642_v0  ;;  %v97_v6 = vsub.s32 0, %v716_v5  ;;  %465 = vmatprep.subr.mxu1 %v642_v0  ;;  %v193_v27 = vsub.s32 1, %v716_v5  ;;  %v198_v28 = vsub.s32 2, %v716_v5  ;;  %v338_v59 = vld [vmem:[#allocation10 + $0x8] sm:$0xff]  ;;  %v337_v60 = vld [vmem:[#allocation10] sm:$0xff]  ;;  %s607_s28 = scalar_lea.vmem %s429_s27, 128  ;;  %p612_p12 = scmp.lt.s32.totalorder %s429_s27, %s429_s27 }
  0x41   :  { %459 = vmatpush3.msra.mxu0 %v92_v2  ;;  %466 = vmatpush3.msra.mxu1 %v217_v16  ;;  %p608_p11 = scmp.ne.s32.totalorder %s429_s27, %s607_s28  ;;  %p613_p13 = scmp.lt.s32.totalorder %s607_s28, %s607_s28 }
  0x42   :  { %461 = vmatmul.mubr.msk.f32.vlgmr.msra.gmra.mxu0 %vm99_vm1, %v91_v3  ;;  %474 = vmatprep.subr.mxu0 %v642_v0  ;;  %v98_v8 = vrot.slane %v94_v7, %v97_v6  ;;  %v194_v29 = vrot.slane %v94_v7, %v193_v27  ;;  %v199_v32 = vrot.slane %v94_v7, %v198_v28 }
  0x43   :  { %482 = vmatprep.mubr.msk.f32.mxu0 %vm643_vm0, %v642_v0  ;;  %467 = vmatprep.subr.mxu1 %v642_v0  ;;  %v223_v50 = vrot.slane %v219_v49, %v97_v6  ;;  %v316_v6 = vrot.slane %v219_v49, %v193_v27  ;;  %p614_p0 = por %p613_p13, %p612_p12 }
  0x44   :  { %468 = vmatpush3.msra.mxu1 %v216_v17  ;;  %475 = vmatpush3.msra.mxu0 %v340_v57 }
  0x45   :  { %469 = vmatprep.subr.mxu1 %v642_v0  ;;  %476 = vmatprep.subr.mxu0 %v642_v0  ;;  %p615_p1 = pnand %p614_p0, %p608_p11 }
  0x46   :  { %470 = vmatpush3.msra.mxu1 %v215_v18  ;;  %477 = vmatpush3.msra.mxu0 %v339_v58 }
  0x47   :  { %478 = vmatprep.subr.mxu0 %v642_v0 }
  0x48   :  { %479 = vmatpush3.msra.mxu0 %v338_v59 }
  0x49   :  { %480 = vmatprep.subr.mxu0 %v642_v0 }
  0x4a   :  { %481 = vmatpush3.msra.mxu0 %v337_v60 }
 0x102   :  { %v169_v9 = vpop.f32.mrf.mxu0 }
 0x103   :  { %v170_v10 = vadd.f32 %v169_v9, %v98_v8  ;;  %v321_v9 = vrot.slane %v219_v49, %v198_v28 }
 0x104   :  { %v462_v11 = vpop.f32.mrf.mxu0 }
 0x105   :  { %v174_v12 = vsel %vm173_vm2, %v170_v10, 0.0  ;;  %v179_v13 = vmul.f32 %v170_v10, %v170_v10 }
 0x106   :  { %175 = vadd.xlane.f32.xlu0 %v174_v12 }
 0x107   :  { %v180_v14 = vsel %vm173_vm2, %v179_v13, 0.0 }
 0x10a   :  { %181 = vadd.xlane.f32.xlu0 %v180_v14 }
 0x18f   :  { %v176_v19 = vpop.xlane.xlu0 %175 }
 0x190   :  { %v178_v20 = vmul.f32 0.03125, %v176_v19 }
 0x192   :  { %v184_v22 = vmul.f32 %v178_v20, %v178_v20  ;;  %v187_v30 = vsub.f32 %v170_v10, %v178_v20 }
 0x193   :  { %v182_v21 = vpop.xlane.xlu0 %181 }
 0x194   :  { %v183_v23 = vmul.f32 0.03125, %v182_v21 }
 0x196   :  { %v185_v24 = vsub.f32 %v183_v23, %v184_v22 }
 0x198   :  { %v186_v25 = vmax.f32 %v185_v24, 0.0 }
 0x19a   :  { %v188_v26 = vadd.f32 1e-05, %v186_v25  ;;  %v441_v25 = vld [vmem:[%s748_s6] ss:$0 sm:$0xff] }
 0x19c   :  { %495 = vrsqrt.f32 %v188_v26 }
 0x1a9   :  { %v496_v31 = vpop.eup %495 }
 0x1aa   :  { %v190_v33 = vmul.f32 %v496_v31, %v187_v30 }
 0x1ac   :  { %v195_v34 = vmul.f32 %v194_v29, %v190_v33 }
 0x1ae   :  { %v200_v35 = vadd.f32 %v199_v32, %v195_v34 }
 0x1b0   :  { %v201_v36 = vmin.f32 %v200_v35, 20.0  ;;  %vm211_vm3 = vcmp.gt.f32.partialorder %v200_v35, 20.0 }
 0x1b2   :  { %v202_v37 = vmul.f32 1.442695, %v201_v36 }
 0x1b4   :  { %497 = vpow2.f32 %v202_v37 }
 0x1c1   :  { %v498_v38 = vpop.eup %497 }
 0x1c2   :  { %v204_v39 = vadd.f32 2.0, %v498_v38 }
 0x1c4   :  { %v205_v40 = vmul.f32 %v498_v38, %v204_v39 }
 0x1c6   :  { %v206_v41 = vadd.f32 2.0, %v205_v40  ;;  %v212_v46 = vmul.f32 %v205_v40, %v200_v35 }
 0x1c8   :  { %499 = vrcp.f32 %v206_v41 }
 0x1d5   :  { %v500_v42 = vpop.eup %499 }
 0x1d6   :  { %v208_v43 = vmul.f32 %v500_v42, %v206_v41 }
 0x1d8   :  { %v209_v44 = vsub.f32 2.0, %v208_v43 }
 0x1da   :  { %v210_v45 = vmul.f32 %v500_v42, %v209_v44 }
 0x1dc   :  { %v213_v47 = vmul.f32 %v212_v46, %v210_v45 }
 0x1de   :  { %v214_v48 = vsel %vm211_vm3, %v200_v35, %v213_v47 }
 0x1df   :  { %472 = vmatmul.mubr.msk.f32.vlgmr.msra.gmra.mxu1 %vm173_vm2, %v214_v48 }
 0x29f   :  { %v293_v51 = vpop.f32.mrf.mxu1 }
 0x2a0   :  { %v294_v52 = vadd.f32 %v293_v51, %v223_v50 }
 0x2a1   :  { %v473_v53 = vpop.f32.mrf.mxu1 }
 0x2a2   :  { %v297_v54 = vsel %vm173_vm2, %v294_v52, 0.0  ;;  %v301_v55 = vmul.f32 %v294_v52, %v294_v52 }
 0x2a3   :  { %298 = vadd.xlane.f32.xlu1 %v297_v54 }
 0x2a4   :  { %v302_v56 = vsel %vm173_vm2, %v301_v55, 0.0 }
 0x2a7   :  { %303 = vadd.xlane.f32.xlu1 %v302_v56 }
 0x32c   :  { %v299_v61 = vpop.xlane.xlu1 %298 }
 0x32d   :  { %v300_v62 = vmul.f32 0.03125, %v299_v61 }
 0x32f   :  { %v306_v1 = vmul.f32 %v300_v62, %v300_v62  ;;  %v309_v7 = vsub.f32 %v294_v52, %v300_v62 }
 0x330   :  { %v304_v63 = vpop.xlane.xlu1 %303 }
 0x331   :  { %v305_v2 = vmul.f32 0.03125, %v304_v63 }
 0x333   :  { %v307_v3 = vsub.f32 %v305_v2, %v306_v1 }
 0x335   :  { %v308_v4 = vmax.f32 %v307_v3, 0.0 }
 0x337   :  { %v310_v5 = vadd.f32 1e-05, %v308_v4 }
 0x339   :  { %501 = vrsqrt.f32 %v310_v5 }
 0x346   :  { %v502_v8 = vpop.eup %501 }
 0x347   :  { %v312_v10 = vmul.f32 %v502_v8, %v309_v7 }
 0x349   :  { %v317_v11 = vmul.f32 %v316_v6, %v312_v10 }
 0x34b   :  { %v322_v12 = vadd.f32 %v321_v9, %v317_v11 }
 0x34d   :  { %v323_v13 = vmin.f32 %v322_v12, 20.0  ;;  %vm333_vm4 = vcmp.gt.f32.partialorder %v322_v12, 20.0 }
 0x34f   :  { %v324_v14 = vmul.f32 1.442695, %v323_v13 }
 0x351   :  { %503 = vpow2.f32 %v324_v14 }
 0x35e   :  { %v504_v0 = vpop.eup %503 }
 0x35f   :  { %v326_v15 = vadd.f32 2.0, %v504_v0 }
 0x361   :  { %v327_v16 = vmul.f32 %v504_v0, %v326_v15 }
 0x363   :  { %v328_v17 = vadd.f32 2.0, %v327_v16  ;;  %v334_v22 = vmul.f32 %v327_v16, %v322_v12 }
 0x365   :  { %505 = vrcp.f32 %v328_v17 }
 0x372   :  { %v506_v18 = vpop.eup %505 }
 0x373   :  { %v330_v19 = vmul.f32 %v506_v18, %v328_v17 }
 0x375   :  { %v331_v20 = vsub.f32 2.0, %v330_v19 }
 0x377   :  { %v332_v21 = vmul.f32 %v506_v18, %v331_v20 }
 0x379   :  { %v335_v23 = vmul.f32 %v334_v22, %v332_v21 }
 0x37b   :  { %v336_v24 = vsel %vm333_vm4, %v322_v12, %v335_v23 }
 0x37c   :  { %483 = vmatmul.mubr.msk.f32.vlgmr.msra.gmra.mxu0 %vm173_vm2, %v336_v24 }
 0x43c   :  { %v417_v26 = vpop.f32.mrf.mxu0 }
 0x43d   :  { %v418_v27 = vadd.f32 %v441_v25, %v417_v26 }
 0x43e   :  { %v484_v28 = vpop.f32.mrf.mxu0 }
 0x43f   :  { %421 = vst [vmem:[#allocation11] sm:$0xff] %v418_v27 }
 0x440   :  { %618 = shalt.err (!%p615_p1)
}
 0x441   :  { %431 = dma.vmem_to_hbm [thread:$0]  %s429_s27, 128, %s749_s7, [#allocation4]  }
 0x442   :  { %633 = dma.done.wait [#allocation4], 128  }
 0x443   :  { %634 = vsyncadd [#allocation4], 4294967168 }
 0x444   :  { %435 = vsyncpa [#allocation3], 1 }
 0x445   :  { %436 = vsyncpa [#allocation6], 1 }
 0x446   :  { %437 = vsyncpa [#allocation9], 1 }
 0x447   :  { %438 = vsyncpa [#allocation4], 1 }

</bundles_post_ra>
